<compile_context>
chip_gen: v7x
topology: tpu7x:2x2x1
jax: 0.10.0
libtpu: 0.0.40
codegen_flags: <defaults>
</compile_context>

<pallas_src>
import jax
import jax.numpy as jnp
from jax import lax
from jax.experimental import pallas as pl
from jax.experimental.pallas import tpu as pltpu

# Safe on every generation: <= default scoped limit on v6e/v7x, well under
# physical VMEM on v5e; our tiles need far less than this anyway.
_VMEM_LIMIT_BYTES = 32 * 1024 * 1024


# ----------------------------------------------------------------------------
# Tiled linear projection kernel:  y = x @ w.T   (nn.Linear, bias=False)
#   x: [M, K]   w: [N, K]   y: [M, N]
# ----------------------------------------------------------------------------
def _matmul_kernel(x_ref, w_ref, o_ref, acc_ref):
    @pl.when(pl.program_id(2) == 0)
    def _init():
        acc_ref[...] = jnp.zeros_like(acc_ref)

    # Contract K of x with K of w directly -> no in-kernel transpose of w.
    acc_ref[...] += lax.dot_general(
        x_ref[...], w_ref[...],
        dimension_numbers=(((1,), (1,)), ((), ())),
        preferred_element_type=jnp.float32)

    @pl.when(pl.program_id(2) == pl.num_programs(2) - 1)
    def _store():
        o_ref[...] = acc_ref[...].astype(o_ref.dtype)


def _pick_tile(dim, cap, align):
    """Largest tile <= cap that divides dim (aligned), else the full dim."""
    if dim <= cap:
        return dim
    t = (cap // align) * align
    while t >= align:
        if dim % t == 0:
            return t
        t -= align
    return dim


def pallas_linear(x2d, w, *, tm_cap=256, tn_cap=256, tk_cap=512):
    """x2d: [M, K], w: [N, K] (PyTorch Linear layout) -> [M, N]."""
    M, K = x2d.shape
    N = w.shape[0]
    tm = _pick_tile(M, tm_cap, 8)
    tn = _pick_tile(N, tn_cap, 128)
    tk = _pick_tile(K, tk_cap, 128)
    grid = (M // tm, N // tn, K // tk)
    return pl.pallas_call(
        _matmul_kernel,
        out_shape=jax.ShapeDtypeStruct((M, N), x2d.dtype),
        grid=grid,
        in_specs=[
            pl.BlockSpec((tm, tk), lambda i, j, k: (i, k)),
            pl.BlockSpec((tn, tk), lambda i, j, k: (j, k)),
        ],
        out_specs=pl.BlockSpec((tm, tn), lambda i, j, k: (i, j)),
        scratch_shapes=[pltpu.VMEM((tm, tn), jnp.float32)],
        compiler_params=pltpu.CompilerParams(
            dimension_semantics=("parallel", "parallel", "arbitrary"),
            vmem_limit_bytes=_VMEM_LIMIT_BYTES),
    )(x2d, w)


# ----------------------------------------------------------------------------
# Fused attention kernel (per batch element, per block of heads):
#   attn = softmax(q @ k^T + bias(pos_bias, mask));  out = attn @ v
# Q/K/V live in [B, L, S, n, c] arrays (S = fused q/k/v slot), heads selected
# via BlockSpec; output is written head-interleaved as [B, L1, n*c].
# ----------------------------------------------------------------------------
def _pick_heads_per_block(n, c, L1, L2, score_budget_bytes=2 * 1024 * 1024):
    # Block constraints: heads-per-block must equal n, or be a multiple of 8
    # with a lane-dense (hb*c % 128 == 0) output slab.
    valid = [d for d in range(1, n + 1)
             if n % d == 0 and (d == n or (d % 8 == 0 and (d * c) % 128 == 0))]
    fitting = [d for d in valid if d * L1 * L2 * 4 <= score_budget_bytes]
    return max(fitting) if fitting else min(valid)


def _make_attention_kernel(hb, has_bias, has_mask, mask_fill):
    def kernel(*refs):
        i = 3
        q_ref, k_ref, v_ref = refs[0], refs[1], refs[2]
        bias_ref = None
        mask_ref = None
        if has_bias:
            bias_ref = refs[i]; i += 1
        if has_mask:
            mask_ref = refs[i]; i += 1
        o_ref = refs[i]

        q_all = q_ref[...]                      # (1, L1, 1, hb, c)
        k_all = k_ref[...]                      # (1, L2, 1, hb, c)
        v_all = v_ref[...]                      # (1, L2, 1, hb, c)
        bias_all = bias_ref[...] if has_bias else None   # (1, hb, L1, L2)
        if has_mask:
            masked = mask_ref[...][0] == 0      # (Lm, L2), Lm in {1, L1}

        outs = []
        for hh in range(hb):                    # static unroll over heads in block
            q = q_all[0, :, 0, hh, :]           # (L1, c)
            k = k_all[0, :, 0, hh, :]           # (L2, c)
            v = v_all[0, :, 0, hh, :]           # (L2, c)

            # MXU matmul, f32 accumulation.  No 1/sqrt(c) scaling (T5).
            s = lax.dot_general(q, k, (((1,), (1,)), ((), ())),
                                preferred_element_type=jnp.float32)   # (L1, L2)

            if has_bias:
                bias = bias_all[0, hh].astype(jnp.float32)
                if has_mask:
                    bias = jnp.where(masked, mask_fill, bias)
                s = s + bias
            elif has_mask:
                s = jnp.where(masked, s + mask_fill, s)

            # f32 softmax (matches F.softmax(attn.float(), dim=-1)).
            s = s - jnp.max(s, axis=-1, keepdims=True)
            p = jnp.exp(s)
            p = p * pl.reciprocal(jnp.sum(p, axis=-1, keepdims=True), approx=True)

            outs.append(jnp.dot(p.astype(v.dtype), v,
                                preferred_element_type=jnp.float32))  # (L1, c)

        o = outs[0] if hb == 1 else jnp.concatenate(outs, axis=-1)    # (L1, hb*c)
        o_ref[0] = o.astype(o_ref.dtype)

    return kernel


def pallas_attention(q_arr, q_sel, k_arr, k_sel, v_arr, v_sel,
                     num_heads, head_dim, pos_bias=None, mask=None,
                     mask_fill=float(jnp.finfo(jnp.float32).min)):
    """
    q_arr: [B, L1, Sq, n, c]  (Sq = 1 or 3),   q at slot q_sel
    k_arr/v_arr: [B, L2, Sk, n, c],            k/v at slots k_sel/v_sel
    pos_bias: broadcastable to [B, n, L1, L2] or None
    mask: [B, L2] or [B, L1, L2] or None
    returns [B, L1, n*c] (head-interleaved, ready for the output projection)
    """
    B, L1 = q_arr.shape[0], q_arr.shape[1]
    L2 = k_arr.shape[1]
    n, c = num_heads, head_dim
    hb = _pick_heads_per_block(n, c, L1, L2)

    def qkv_spec(L, sel):
        return pl.BlockSpec((1, L, 1, hb, c),
                            lambda b, h, sel=sel: (b, 0, sel, h, 0))

    in_arrays = [q_arr, k_arr, v_arr]
    in_specs = [qkv_spec(L1, q_sel), qkv_spec(L2, k_sel), qkv_spec(L2, v_sel)]

    has_bias = pos_bias is not None
    has_mask = mask is not None

    if has_bias:
        pb = jnp.asarray(pos_bias)
        if pb.ndim < 4:
            pb = pb.reshape((1,) * (4 - pb.ndim) + pb.shape)
        pb = jnp.broadcast_to(pb, (pb.shape[0], n, L1, L2))
        in_arrays.append(pb)
        if pb.shape[0] == 1:
            # Shared across batch: broadcast via the index_map, no B copies in HBM.
            in_specs.append(pl.BlockSpec((1, hb, L1, L2), lambda b, h: (0, h, 0, 0)))
        else:
            in_specs.append(pl.BlockSpec((1, hb, L1, L2), lambda b, h: (b, h, 0, 0)))

    if has_mask:
        m = mask if mask.ndim == 3 else mask.reshape(B, 1, L2)
        in_arrays.append(m)
        in_specs.append(pl.BlockSpec((1, m.shape[1], L2), lambda b, h: (b, 0, 0)))

    kernel = _make_attention_kernel(hb, has_bias, has_mask, mask_fill)

    return pl.pallas_call(
        kernel,
        out_shape=jax.ShapeDtypeStruct((B, L1, n * c), q_arr.dtype),
        grid=(B, n // hb),
        in_specs=in_specs,
        out_specs=pl.BlockSpec((1, L1, hb * c), lambda b, h: (b, 0, h)),
        compiler_params=pltpu.CompilerParams(
            dimension_semantics=("parallel", "parallel"),
            vmem_limit_bytes=_VMEM_LIMIT_BYTES),
    )(*in_arrays)


# ----------------------------------------------------------------------------
# Full T5Attention forward (eval mode: dropout == identity)
# ----------------------------------------------------------------------------
def t5_attention_forward(x, params, num_heads, context=None, mask=None,
                         pos_bias=None, compute_dtype=None):
    """
    x:        [B, L1, C]
    context:  [B, L2, C] or None
    mask:     [B, L2] or [B, L1, L2] or None
    pos_bias: broadcastable to [B, n, L1, L2] or None
    compute_dtype: e.g. jnp.bfloat16 for fast-MXU matmuls (f32 accumulation);
                   None -> use the input dtype.
    """
    self_attn = context is None
    ctx = x if self_attn else context
    B, L1, C = x.shape
    L2 = ctx.shape[1]
    n = num_heads
    dim_attn = params["wq"].shape[0]
    assert dim_attn % n == 0
    c = dim_attn // n
    mask_fill = float(jnp.finfo(x.dtype).min)   # torch.finfo(x.dtype).min

    cd = x.dtype if compute_dtype is None else compute_dtype
    xc = x.astype(cd)
    wq, wk, wv, wo = (params[k].astype(cd) for k in ("wq", "wk", "wv", "wo"))

    if self_attn:
        # Fused QKV projection: activations read from HBM once.
        # (In a real model the concatenated weight would be built once offline.)
        w_qkv = jnp.concatenate([wq, wk, wv], axis=0)            # [3*dim_attn, C]
        qkv = pallas_linear(xc.reshape(B * L1, C), w_qkv)        # [B*L1, 3*dim_attn]
        qkv = qkv.reshape(B, L1, 3, n, c)                        # free reshape
        q_arr = k_arr = v_arr = qkv
        q_sel, k_sel, v_sel = 0, 1, 2
    else:
        ctxc = ctx.astype(cd)
        q_arr = pallas_linear(xc.reshape(B * L1, C), wq).reshape(B, L1, 1, n, c)
        w_kv = jnp.concatenate([wk, wv], axis=0)                 # [2*dim_attn, C]
        kv = pallas_linear(ctxc.reshape(B * L2, C), w_kv).reshape(B, L2, 2, n, c)
        k_arr = v_arr = kv
        q_sel, k_sel, v_sel = 0, 0, 1

    # Fused attention.  Output is already [B, L1, n*c] (head-interleaved,
    # lane dense) so no transpose/reshape pass is needed before the o-proj.
    attn_out = pallas_attention(q_arr, q_sel, k_arr, k_sel, v_arr, v_sel,
                                n, c, pos_bias=pos_bias, mask=mask,
                                mask_fill=mask_fill)

    out = pallas_linear(attn_out.reshape(B * L1, dim_attn), wo)  # [B*L1, C]
    out = out.reshape(B, L1, C).astype(x.dtype)
    # dropout == identity (eval).  # TODO(synk): training-mode dropout not implemented.
    return out


# ----------------------------------------------------------------------------
# Pure-JAX reference (mirrors the PyTorch forward) for verification
# ----------------------------------------------------------------------------
def t5_attention_reference(x, params, num_heads, context=None, mask=None,
                           pos_bias=None):
    context = x if context is None else context
    B, L1, C = x.shape
    n = num_heads
    dim_attn = params["wq"].shape[0]
    c = dim_attn // n

    q = (x @ params["wq"].T).reshape(B, -1, n, c)
    k = (context @ params["wk"].T).reshape(B, -1, n, c)
    v = (context @ params["wv"].T).reshape(B, -1, n, c)

    attn_bias = jnp.zeros((B, n, q.shape[1], k.shape[1]), dtype=x.dtype)
    if pos_bias is not None:
        attn_bias = attn_bias + pos_bias.astype(x.dtype)
    if mask is not None:
        m = mask.reshape(B, 1, 1, -1) if mask.ndim == 2 else mask[:, None, :, :]
        attn_bias = jnp.where(m == 0, jnp.finfo(x.dtype).min, attn_bias)

    attn = jnp.einsum("binc,bjnc->bnij", q, k) + attn_bias
    attn = jax.nn.softmax(attn.astype(jnp.float32), axis=-1).astype(attn.dtype)
    out = jnp.einsum("bnij,bjnc->binc", attn, v)
    out = out.reshape(B, -1, n * c)
    return out @ params["wo"].T


if __name__ == "__main__":
    # Small shapes consistent with the module.
    B, L, dim, dim_attn, num_heads = 2, 8, 32, 32, 4
    key = jax.random.PRNGKey(0)
    kx, kq, kk, kv, ko, kp, kc = jax.random.split(key, 7)

    x = jax.random.normal(kx, (B, L, dim), dtype=jnp.float32)

    # nn.Linear weight layout: [out_features, in_features]
    params = {
        "wq": 0.05 * jax.random.normal(kq, (dim_attn, dim), dtype=jnp.float32),
        "wk": 0.05 * jax.random.normal(kk, (dim_attn, dim), dtype=jnp.float32),
        "wv": 0.05 * jax.random.normal(kv, (dim_attn, dim), dtype=jnp.float32),
        "wo": 0.05 * jax.random.normal(ko, (dim, dim_attn), dtype=jnp.float32),
    }

    # --- Self-attention with relative-position bias and padding mask ---------
    pos_bias = 0.1 * jax.random.normal(kp, (1, num_heads, L, L), dtype=jnp.float32)
    mask = jnp.ones((B, L), dtype=jnp.int32).at[1, -2:].set(0)       # [B, L2]

    out = t5_attention_forward(x, params, num_heads, mask=mask, pos_bias=pos_bias)
    out = jax.block_until_ready(out)
    ref = t5_attention_reference(x, params, num_heads, mask=mask, pos_bias=pos_bias)
    assert out.shape == (B, L, dim)
    # Tolerance accounts for the approx (EUP) reciprocal in the softmax denom.
    assert jnp.allclose(out, ref, atol=2e-3, rtol=2e-3), "self-attn mismatch"

    # --- Cross-attention (context length != query length) --------------------
    L2 = 16
    context = jax.random.normal(kc, (B, L2, dim), dtype=jnp.float32)
    cmask = jnp.ones((B, L2), dtype=jnp.int32).at[0, -3:].set(0)
    out_x = t5_attention_forward(x, params, num_heads, context=context, mask=cmask)
    out_x = jax.block_until_ready(out_x)
    ref_x = t5_attention_reference(x, params, num_heads, context=context, mask=cmask)
    assert out_x.shape == (B, L, dim)
    assert jnp.allclose(out_x, ref_x, atol=2e-3, rtol=2e-3), "cross-attn mismatch"

    print("KERNEL_OK")
</pallas_src>

<mosaic_0001>
module attributes {stable_mosaic.version = 11 : i64} {
  func.func @_matmul_kernel(%arg0: i32, %arg1: i32, %arg2: i32, %arg3: memref<16x32xf32, #tpu.memory_space<vmem>>, %arg4: memref<96x32xf32, #tpu.memory_space<vmem>>, %arg5: memref<16x96xf32, #tpu.memory_space<vmem>>, %arg6: memref<16x96xf32, #tpu.memory_space<vmem>>) attributes {dimension_semantics = [#tpu.dimension_semantics<parallel>, #tpu.dimension_semantics<parallel>, #tpu.dimension_semantics<arbitrary>], iteration_bounds = array<i64: 1, 1, 1>, scalar_prefetch = 0 : i64, scratch_operands = 1 : i64, tpu.core_type = #tpu.core_type<tc>, window_params = [{transform_indices = @transform_0, window_bounds = array<i64: 16, 32>}, {transform_indices = @transform_1, window_bounds = array<i64: 96, 32>}, {transform_indices = @transform_2, window_bounds = array<i64: 16, 96>}]} {
    %c0_i32 = arith.constant 0 : i32
    %0 = arith.cmpi eq, %arg2, %c0_i32 : i32
    %1 = arith.extui %0 : i1 to i32
    %c0_i32_0 = arith.constant 0 : i32
    %2 = arith.cmpi ne, %1, %c0_i32_0 : i32
    scf.if %2 {
      %cst_10 = arith.constant 0.000000e+00 : f32
      %12 = vector.broadcast %cst_10 : f32 to vector<16x96xf32>
      %c0_11 = arith.constant 0 : index
      %c0_12 = arith.constant 0 : index
      %13 = vector.load %arg6[%c0_11, %c0_12] : memref<16x96xf32, #tpu.memory_space<vmem>>, vector<16x96xf32>
      tpu.vector_store %arg6[%c0_11, %c0_12], %12 {strides = array<i32>} : memref<16x96xf32, #tpu.memory_space<vmem>>, vector<16x96xf32>,
    } else {
    }
    %c0 = arith.constant 0 : index
    %c0_1 = arith.constant 0 : index
    %3 = vector.load %arg6[%c0, %c0_1] : memref<16x96xf32, #tpu.memory_space<vmem>>, vector<16x96xf32>
    %c0_2 = arith.constant 0 : index
    %c0_3 = arith.constant 0 : index
    %4 = vector.load %arg3[%c0_2, %c0_3] : memref<16x32xf32, #tpu.memory_space<vmem>>, vector<16x32xf32>
    %c0_4 = arith.constant 0 : index
    %c0_5 = arith.constant 0 : index
    %5 = vector.load %arg4[%c0_4, %c0_5] : memref<96x32xf32, #tpu.memory_space<vmem>>, vector<96x32xf32>
    %cst = arith.constant dense<0.000000e+00> : vector<16x96xf32>
    %6 = tpu.matmul %4, %5, %cst {dimension_numbers = #tpu.dot_dimension_numbers<[1], [1], [0], [0], [0, 0, 1, 0], [], []>} : vector<16x32xf32>, vector<96x32xf32>, vector<16x96xf32> -> vector<16x96xf32>
    %7 = arith.addf %3, %6 : vector<16x96xf32>
    %c0_6 = arith.constant 0 : index
    %c0_7 = arith.constant 0 : index
    %8 = vector.load %arg6[%c0_6, %c0_7] : memref<16x96xf32, #tpu.memory_space<vmem>>, vector<16x96xf32>
    tpu.vector_store %arg6[%c0_6, %c0_7], %7 {strides = array<i32>} : memref<16x96xf32, #tpu.memory_space<vmem>>, vector<16x96xf32>,
    %c0_i32_8 = arith.constant 0 : i32
    %9 = arith.cmpi eq, %arg2, %c0_i32_8 : i32
    %10 = arith.extui %9 : i1 to i32
    %c0_i32_9 = arith.constant 0 : i32
    %11 = arith.cmpi ne, %10, %c0_i32_9 : i32
    scf.if %11 {
      %c0_10 = arith.constant 0 : index
      %c0_11 = arith.constant 0 : index
      %12 = vector.load %arg6[%c0_10, %c0_11] : memref<16x96xf32, #tpu.memory_space<vmem>>, vector<16x96xf32>
      %c0_12 = arith.constant 0 : index
      %c0_13 = arith.constant 0 : index
      %13 = vector.load %arg5[%c0_12, %c0_13] : memref<16x96xf32, #tpu.memory_space<vmem>>, vector<16x96xf32>
      tpu.vector_store %arg5[%c0_12, %c0_13], %12 {strides = array<i32>} : memref<16x96xf32, #tpu.memory_space<vmem>>, vector<16x96xf32>,
    } else {
    }
    return
  }
  func.func @transform_0(%arg0: i32, %arg1: i32, %arg2: i32) -> (i32, i32) {
    %c0_i32 = arith.constant 0 : i32
    return %arg0, %arg2 : i32, i32
  }
  func.func @transform_1(%arg0: i32, %arg1: i32, %arg2: i32) -> (i32, i32) {
    %c0_i32 = arith.constant 0 : i32
    return %arg1, %arg2 : i32, i32
  }
  func.func @transform_2(%arg0: i32, %arg1: i32, %arg2: i32) -> (i32, i32) {
    %c0_i32 = arith.constant 0 : i32
    return %arg0, %arg1 : i32, i32
  }
}

</mosaic_0001>

<bundles_post_ra>
// kernel: tpu_custom_call.1
= control target key start
LH: loop header
LB: loop body
LE: loop exit
PB: predicated region body
PF: predicated region fallthrough
CT: control target
= control target key end

     0   :  { %vm35_vm0 = vcmask 261120   ;;  %vm16_vm1 = vcmask 785408   ;;  %v300_v6 = vmov 0.0   ;;  %s411_s0 = inlined_call_operand.vmem [shape: f32[16,32], index: 0, kind: input, shape index: {}]   ;;  %s412_s1 = inlined_call_operand.vmem [shape: f32[96,32], index: 1, kind: input, shape index: {}]   ;;  %s413_s2 = inlined_call_operand.hbm [shape: f32[16,96], index: 2, kind: output, shape index: {}]  }
   0x1   :  { %v23_v0 = vld [vmem:[%s412_s1] sm:$0xff]  ;;  %v24_v1 = vld [vmem:[%s412_s1 + $0x8] sm:$0xff]  ;;  %v25_v2 = vld [vmem:[%s412_s1 + $0x10] sm:$0xff]  ;;  %18 = vst.msk [vmem:[#allocation2 + $0x8] sm:$0xff] %vm16_vm1, %v300_v6 }
   0x2   :  { %v236_v3 = vpack.c.bf16 %v24_v1, %v23_v0  ;;  %vm330_vm2 = vmpackc.low %vm35_vm0, %vm35_vm0  ;;  %v26_v5 = vld [vmem:[%s412_s1 + $0x18] sm:$0xff]  ;;  %17 = vst.msk [vmem:[#allocation2] sm:$0xff] %vm16_vm1, %v300_v6  ;;  %v21_v8 = vld [vmem:[%s411_s0] sm:$0xff] }
   0x3   :  { %v242_v7 = vpack.c.bf16 %v26_v5, %v25_v2  ;;  %233 = vmatprep.mubr.msk.f32.mxu0 %vm35_vm0, %v21_v8 }
   0x4   :  { %238 = vmatprep.subr.msk.bf16.mxu0 %vm330_vm2, %v236_v3 }
   0x5   :  { %241 = vmatpush3.bf16.xpose.msk.msra.mxu0 %vm330_vm2, %v236_v3 }
   0x6   :  { %244 = vmatprep.subr.msk.bf16.mxu0 %vm330_vm2, %v242_v7 }
   0x7   :  { %7 = vsyncpa [#allocation4], 0  ;;  %v27_v9 = vld [vmem:[%s412_s1 + $0x20] sm:$0xff]  ;;  %v28_v10 = vld [vmem:[%s412_s1 + $0x28] sm:$0xff] }
   0x8   :  { %v248_v11 = vpack.c.bf16 %v28_v10, %v27_v9  ;;  %v29_v12 = vld [vmem:[%s412_s1 + $0x30] sm:$0xff]  ;;  %v30_v13 = vld [vmem:[%s412_s1 + $0x38] sm:$0xff]  ;;  %v31_v15 = vld [vmem:[%s412_s1 + $0x40] sm:$0xff] }
   0x9   :  { %v254_v14 = vpack.c.bf16 %v30_v13, %v29_v12  ;;  %v32_v16 = vld [vmem:[%s412_s1 + $0x48] sm:$0xff]  ;;  %v33_v18 = vld [vmem:[%s412_s1 + $0x50] sm:$0xff]  ;;  %v34_v19 = vld [vmem:[%s412_s1 + $0x58] sm:$0xff]  ;;  %s301_s1 = smov [#allocation3]  }
   0xa   :  { %v260_v17 = vpack.c.bf16 %v32_v16, %v31_v15  ;;  %v266_v20 = vpack.c.bf16 %v34_v19, %v33_v18  ;;  %v22_v21 = vld [vmem:[%s411_s0 + $0x8] sm:$0xff]  ;;  %v19_v23 = vld [vmem:[#allocation2] sm:$0xff]  ;;  %s170_s9 = sshll.u32 %s301_s1, 4  ;;  %s171_s9 = int_to_ptr.vmem [resolvable:$true] %s170_s9 }
   0xb   :  { %v20_v22 = vld [vmem:[#allocation2 + $0x8] sm:$0xff]  ;;  %s276_s0 = scalar_lea.vmem %s171_s9, 256  ;;  %p281_p1 = scmp.lt.s32.totalorder %s171_s9, %s171_s9 }
   0xc   :  { %p277_p0 = scmp.ne.s32.totalorder %s171_s9, %s276_s0  ;;  %p282_p2 = scmp.lt.s32.totalorder %s276_s0, %s276_s0 }
   0xd   :  { %247 = vmatpush3.bf16.xpose.msk.msra.mxu0 %vm330_vm2, %v242_v7 }
   0xe   :  { %250 = vmatprep.subr.msk.bf16.mxu0 %vm330_vm2, %v248_v11  ;;  %p283_p3 = por %p282_p2, %p281_p1 }
  0x10   :  { %p284_p4 = pnand %p283_p3, %p277_p0 }
  0x15   :  { %253 = vmatpush3.bf16.xpose.msk.msra.mxu0 %vm330_vm2, %v248_v11 }
  0x16   :  { %256 = vmatprep.subr.msk.bf16.mxu0 %vm330_vm2, %v254_v14 }
  0x1d   :  { %259 = vmatpush3.bf16.xpose.msk.msra.mxu0 %vm330_vm2, %v254_v14 }
  0x1e   :  { %262 = vmatprep.subr.msk.bf16.mxu0 %vm330_vm2, %v260_v17 }
  0x25   :  { %265 = vmatpush3.bf16.xpose.msk.msra.mxu0 %vm330_vm2, %v260_v17 }
  0x26   :  { %268 = vmatprep.subr.msk.bf16.mxu0 %vm330_vm2, %v266_v20 }
  0x2d   :  { %271 = vmatpush3.bf16.xpose.msk.msra.mxu0 %vm330_vm2, %v266_v20 }
  0x34   :  { %234 = vmatmul.mubr.msk.f32.vlgmr.msra.gmra.mrb[0].mxu0 %vm35_vm0, %v22_v21 }
 0x107   :  { %v235_v24 = vpop.f32.mrb[0].mxu0 }
 0x108   :  { %v154_v25 = vadd.f32 %v235_v24, %v20_v22  ;;  %v144_v26 = vpop.f32.mrb[1].mxu0 }
 0x109   :  { %v153_v27 = vadd.f32 %v144_v26, %v19_v23 }
 0x10a   :  { %157 = vst.msk [vmem:[#allocation2 + $0x8] sm:$0xff] %vm16_vm1, %v154_v25 }
 0x10b   :  { %156 = vst.msk [vmem:[#allocation2] sm:$0xff] %vm16_vm1, %v153_v27 }
 0x111   :  { %v162_v28 = vld [vmem:[#allocation2 + $0x8] sm:$0xff] }
 0x112   :  { %v161_v29 = vld [vmem:[#allocation2] sm:$0xff]  ;;  %164 = vst.msk [vmem:[#allocation3 + $0x8] sm:$0xff] %vm16_vm1, %v162_v28 }
 0x113   :  { %163 = vst.msk [vmem:[#allocation3] sm:$0xff] %vm16_vm1, %v161_v29 }
 0x114   :  { %287 = shalt.err (!%p284_p4)
}
 0x115   :  { %s288_s12 = scalar_lea.hbm %s413_s2, 256 }
 0x116   :  { %p289_p5 = scmp.ne.s32.totalorder %s413_s2, %s288_s12  ;;  %p292_p6 = scmp.lt.u32.totalorder %s288_s12, %s413_s2 }
 0x118   :  { %p294_p7 = pnand %p292_p6, %p289_p5 }
 0x11a   :  { %297 = shalt.err (!%p294_p7)
}
 0x11b   :  { %s302_s17 = smov 128   ;;  %s303_s18 = smov 8  }
 0x11c   :  { %176 = dma.vmem_to_hbm [thread:$0]  %s171_s9, 256, %s413_s2, [#allocation4], %s302_s17, %s302_s17, %s303_s18  }
 0x11d   :  { %298 = dma.done.wait [#allocation4], 256  }
 0x11e   :  { %299 = vsyncadd [#allocation4], 4294967040 }
 0x11f   :  { %180 = vsyncpa [#allocation4], 1 }

</bundles_post_ra>
